<compile_context>
chip_gen: v7x
topology: tpu7x:2x2x1
jax: 0.10.0
libtpu: 0.0.40
codegen_flags: <defaults>
</compile_context>

<pallas_src>
import math

import jax
import jax.numpy as jnp
from jax import lax
from jax.experimental import pallas as pl
from jax.experimental.pallas import tpu as pltpu


def _round_up(x: int, m: int) -> int:
    return -(-x // m) * m


def make_sliding_window_attention(window_size: int, hidden_size: int,
                                  seq_len: int, batch: int,
                                  windows_per_tile: int | None = None,
                                  matmul_dtype=jnp.bfloat16):
    W = window_size
    H = hidden_size
    T = seq_len
    B = batch
    half = W // 2
    n_win = pl.cdiv(T, W)                  # one output row per window
    scale = 1.0 / math.sqrt(H)
    md = jnp.dtype(matmul_dtype)
    recip_approx = md != jnp.dtype(jnp.float32)   # exact divide in strict f32 mode

    # Lane-dense hidden dim: full-width MXU contraction + unmasked output stores.
    Hp = _round_up(H, 128)

    # Halo sized to the K/V dtype's sublane packing (16 rows bf16, 8 rows f32).
    HALO = 8 if md.itemsize >= 4 else 16
    # WT alignment: S = WT*W must be a multiple of HALO (and of 8), and WT itself
    # a multiple of 8 so the q/out blocks are sublane aligned.
    g = HALO // math.gcd(W, HALO)
    ALIGN_WT = (g * 8) // math.gcd(g, 8)   # lcm(g, 8) in {8, 16}

    # ---- choose WT from an MXU-M target, then fit a generation-aware VMEM budget.
    if windows_per_tile is None:
        windows_per_tile = 256             # fill >= one MXU pass (2x256^2 on v6e/v7x)
    WT = max(1, min(windows_per_tile, n_win))
    if B == 1:
        # keep >= ~4 window tiles so a 2-TensorCore chip (v7x) gets parallel work
        WT = min(WT, max(1, pl.cdiv(n_win, 4)))
    WT = _round_up(WT, ALIGN_WT)

    try:                                   # generation-aware VMEM capacity
        vmem_cap = int(getattr(pltpu.get_tpu_info(), "vmem_capacity_bytes",
                               64 * 1024 * 1024))
    except Exception:                      # no info available -> assume v7x (64 MiB)
        vmem_cap = 64 * 1024 * 1024
    budget = int(vmem_cap * 0.6)

    def _vmem_estimate(wt: int) -> int:
        s = wt * W
        slabs = 2 * 2 * (s + HALO) * Hp * md.itemsize      # K,V main+halo, dbl-buffered
        qo = 2 * wt * Hp * (md.itemsize + 4)               # q in (md) + f32 out
        wts = 2 * (2 * Hp * Hp * md.itemsize + 2 * Hp * 4)  # A, Wv (+ c, bv)
        msk = 2 * wt * (s + HALO) * 4                      # band masks (f32)
        tmp = 3 * wt * (s + HALO) * 4 + 3 * wt * Hp * 4    # f32 score/prob + Qp/raw temps
        return slabs + qo + wts + msk + tmp

    while WT > ALIGN_WT and _vmem_estimate(WT) > budget:
        WT = max(ALIGN_WT, _round_up(WT // 2, ALIGN_WT))

    n_tiles = pl.cdiv(n_win, WT)
    n_win_pad = n_tiles * WT
    S = WT * W                              # main K/V slab rows per tile
    assert S % HALO == 0 and S % 8 == 0
    Tpad = max(n_tiles * S + HALO, T + half)
    vmem_limit = int(min(max(2 * _vmem_estimate(WT), 32 * 1024 * 1024),
                         int(vmem_cap * 0.9)))

    # ---- static band mask: window l attends slab columns [l*W, l*W + 2*half].
    #      Independent of batch/tile -> precomputed, constant index_map, fetched
    #      once.  Only the (1, S) sequence-range check stays in the kernel. ----
    _row = jnp.arange(WT, dtype=jnp.int32)[:, None] * W
    _col_m = jnp.arange(S, dtype=jnp.int32)[None, :]
    _col_h = S + jnp.arange(HALO, dtype=jnp.int32)[None, :]
    band_m = ((_col_m >= _row) & (_col_m <= _row + 2 * half)).astype(jnp.float32)
    band_h = ((_col_h >= _row) & (_col_h <= _row + 2 * half)).astype(jnp.float32)

    dn = (((1,), (1,)), ((), ()))           # contract last dims: (q,h),(s,h)->(q,s)

    def kernel(q_ref, km_ref, kh_ref, vm_ref, vh_ref,
               a_ref, c_ref, wv_ref, bv_ref, mm_ref, mh_ref, o_ref):
        t = pl.program_id(1)
        base = t * S
        f32 = jnp.float32

        # fused query/key projection: q' = q (scale*Wq@Wk^T) + scale*bq@Wk^T
        qp = jnp.dot(q_ref[0], a_ref[...], preferred_element_type=f32) + c_ref[...]
        qc = qp.astype(matmul_dtype)

        # scores against the *raw* K slab; last-dim contraction, no transpose
        s_m = lax.dot_general(qc, km_ref[0], dn, preferred_element_type=f32)
        s_h = lax.dot_general(qc, kh_ref[0], dn, preferred_element_type=f32)

        # per-tile in-range key mask (front zero padding + tail), keys only
        pm = base + lax.broadcasted_iota(jnp.int32, (1, S), 1)
        ph = base + S + lax.broadcasted_iota(jnp.int32, (1, HALO), 1)
        rng_m = ((pm >= half) & (pm < half + T)).astype(f32)
        rng_h = ((ph >= half) & (ph < half + T)).astype(f32)

        # f32 softmax over main + halo blocks; masks applied AFTER exp (the row
        # max over raw scores upper-bounds the masked max, which is all the
        # stability shift needs, and it removes every -inf / NaN path).
        m = jnp.maximum(jnp.max(s_m, axis=-1, keepdims=True),
                        jnp.max(s_h, axis=-1, keepdims=True))
        e_m = jnp.exp(s_m - m) * (mm_ref[...] * rng_m)
        e_h = jnp.exp(s_h - m) * (mh_ref[...] * rng_h)
        denom = (jnp.sum(e_m, axis=-1, keepdims=True)
                 + jnp.sum(e_h, axis=-1, keepdims=True))
        inv = pl.reciprocal(jnp.maximum(denom, 1e-30), approx=recip_approx)

        # deferred value projection: P (v Wv + bv) == (P v) Wv + bv
        raw = (jnp.dot(e_m.astype(matmul_dtype), vm_ref[0],
                       preferred_element_type=f32)
               + jnp.dot(e_h.astype(matmul_dtype), vh_ref[0],
                         preferred_element_type=f32)) * inv
        out = jnp.dot(raw.astype(matmul_dtype), wv_ref[...],
                      preferred_element_type=f32) + bv_ref[...]
        o_ref[0] = out.astype(o_ref.dtype)

    call = pl.pallas_call(
        kernel,
        out_shape=jax.ShapeDtypeStruct((B, n_win_pad, Hp), jnp.float32),
        grid_spec=pltpu.PrefetchScalarGridSpec(
            num_scalar_prefetch=0,
            grid=(B, n_tiles),
            in_specs=[
                pl.BlockSpec((1, WT, Hp), lambda b, t: (b, t, 0)),      # q rows (1/window)
                pl.BlockSpec((1, S, Hp), lambda b, t: (b, t, 0)),       # raw K main slab
                pl.BlockSpec((1, HALO, Hp),
                             lambda b, t: (b, (t + 1) * (S // HALO), 0)),  # raw K halo
                pl.BlockSpec((1, S, Hp), lambda b, t: (b, t, 0)),       # raw V main slab
                pl.BlockSpec((1, HALO, Hp),
                             lambda b, t: (b, (t + 1) * (S // HALO), 0)),  # raw V halo
                # TODO(synk): for very large H, single-buffer these constant
                # weight blocks (pipeline_mode=pl.Buffered(1)) and/or tile the
                # H_out dim on an extra grid axis; kept default here so the
                # kernel stays on the well-trodden lowering path.
                pl.BlockSpec((Hp, Hp), lambda b, t: (0, 0)),            # A = s*Wq@Wk^T
                pl.BlockSpec((1, Hp), lambda b, t: (0, 0)),             # c = s*bq@Wk^T
                pl.BlockSpec((Hp, Hp), lambda b, t: (0, 0)),            # Wv
                pl.BlockSpec((1, Hp), lambda b, t: (0, 0)),             # bv
                pl.BlockSpec((WT, S), lambda b, t: (0, 0)),             # band mask (main)
                pl.BlockSpec((WT, HALO), lambda b, t: (0, 0)),          # band mask (halo)
            ],
            out_specs=pl.BlockSpec((1, WT, Hp), lambda b, t: (b, t, 0)),
        ),
        compiler_params=pltpu.CompilerParams(
            dimension_semantics=("parallel", "parallel"),
            vmem_limit_bytes=vmem_limit),
    )

    @jax.jit
    def fwd(q, k, v, params):
        wq, bq, wk, bk, wv, bv = params
        f32 = jnp.float32

        # Fold Lk into the query side; compose in f32, cast to matmul_dtype after.
        A = (wq.astype(f32) @ wk.astype(f32).T) * scale                  # (H, H)
        c = (bq.astype(f32) @ wk.astype(f32).T) * scale                  # (H,)
        A_p = jnp.zeros((Hp, Hp), f32).at[:H, :H].set(A).astype(matmul_dtype)
        wv_p = jnp.zeros((Hp, Hp), f32).at[:H, :H].set(
            wv.astype(f32)).astype(matmul_dtype)
        c_p = jnp.zeros((1, Hp), f32).at[0, :H].set(c)
        bv_p = jnp.zeros((1, Hp), f32).at[0, :H].set(bv.astype(f32))

        # One query row per window (the module uses q[:, i:i+1] with stride W).
        q_sel = q[:, ::W, :]                                             # (B, n_win, H)
        q_sel = jnp.pad(q_sel.astype(f32),
                        ((0, 0), (0, n_win_pad - n_win),
                         (0, Hp - H))).astype(matmul_dtype)

        # Front-pad K/V by `half` rows so window w reads padded rows
        # [w*W, w*W + 2*half]; tail-pad so every main+halo block is in range.
        kp = jnp.pad(k.astype(f32),
                     ((0, 0), (half, Tpad - T - half),
                      (0, Hp - H))).astype(matmul_dtype)
        vp = jnp.pad(v.astype(f32),
                     ((0, 0), (half, Tpad - T - half),
                      (0, Hp - H))).astype(matmul_dtype)

        out = call(q_sel, kp, kp, vp, vp, A_p, c_p, wv_p, bv_p, band_m, band_h)
        return out[:, :n_win, :H]

    return fwd


def reference(q, k, v, params, window_size):
    """Pure-JAX f32 reference mirroring the PyTorch loop."""
    wq, bq, wk, bk, wv, bv = params
    B, T, H = q.shape
    W = window_size
    outs = []
    for i in range(0, T, W):
        start = max(0, i - W // 2)
        end = min(T, i + W // 2 + 1)
        Q = q[:, i:i + 1] @ wq + bq
        K = k[:, start:end] @ wk + bk
        V = v[:, start:end] @ wv + bv
        scores = jnp.einsum("bqh,bkh->bqk", Q, K) / math.sqrt(H)
        weights = jax.nn.softmax(scores, axis=-1)
        outs.append(jnp.einsum("bqk,bkh->bqh", weights, V))
    return jnp.concatenate(outs, axis=1)


if __name__ == "__main__":
    B, T, H = 2, 8, 32
    window_size = 4

    key = jax.random.PRNGKey(0)
    kq, kk_, kv, k1, k2, k3, k4, k5, k6 = jax.random.split(key, 9)

    q = jax.random.normal(kq, (B, T, H), dtype=jnp.float32)
    k = jax.random.normal(kk_, (B, T, H), dtype=jnp.float32)
    v = jax.random.normal(kv, (B, T, H), dtype=jnp.float32)

    # nn.Linear params, stored transposed as (H_in, H_out) for x @ W + b.
    bound = 1.0 / math.sqrt(H)
    wq = jax.random.uniform(k1, (H, H), jnp.float32, -bound, bound)
    bq = jax.random.uniform(k2, (H,), jnp.float32, -bound, bound)
    wk = jax.random.uniform(k3, (H, H), jnp.float32, -bound, bound)
    bk = jax.random.uniform(k4, (H,), jnp.float32, -bound, bound)
    wv = jax.random.uniform(k5, (H, H), jnp.float32, -bound, bound)
    bv = jax.random.uniform(k6, (H,), jnp.float32, -bound, bound)
    params = (wq, bq, wk, bk, wv, bv)

    ref = reference(q, k, v, params, window_size)

    # 1) strict structural check with f32 MXU operands (exact reciprocal).
    fwd_f32 = make_sliding_window_attention(window_size, H, T, B,
                                            matmul_dtype=jnp.float32)
    out_f32 = jax.block_until_ready(fwd_f32(q, k, v, params))
    assert out_f32.shape == ref.shape, (out_f32.shape, ref.shape)
    assert jnp.allclose(out_f32, ref, rtol=1e-2, atol=1e-2), "f32 mismatch vs reference"

    # 2) fast path: bf16 operands on the MXU, f32 softmax (looser tolerance).
    fwd_bf16 = make_sliding_window_attention(window_size, H, T, B,
                                             matmul_dtype=jnp.bfloat16)
    out_bf16 = jax.block_until_ready(fwd_bf16(q, k, v, params))
    assert out_bf16.shape == ref.shape, (out_bf16.shape, ref.shape)
    assert jnp.allclose(out_bf16, ref, rtol=3e-2, atol=3e-2), "bf16 mismatch vs reference"

    print("KERNEL_OK")
</pallas_src>

<mosaic_0001>
module attributes {stable_mosaic.version = 11 : i64} {
  func.func @kernel(%arg0: i32, %arg1: i32, %arg2: memref<1x8x128xf32, #tpu.memory_space<vmem>>, %arg3: memref<1x32x128xf32, #tpu.memory_space<vmem>>, %arg4: memref<1x8x128xf32, #tpu.memory_space<vmem>>, %arg5: memref<1x32x128xf32, #tpu.memory_space<vmem>>, %arg6: memref<1x8x128xf32, #tpu.memory_space<vmem>>, %arg7: memref<128x128xf32, #tpu.memory_space<vmem>>, %arg8: memref<1x128xf32, #tpu.memory_space<vmem>>, %arg9: memref<128x128xf32, #tpu.memory_space<vmem>>, %arg10: memref<1x128xf32, #tpu.memory_space<vmem>>, %arg11: memref<8x32xf32, #tpu.memory_space<vmem>>, %arg12: memref<8x8xf32, #tpu.memory_space<vmem>>, %arg13: memref<1x8x128xf32, #tpu.memory_space<vmem>>) attributes {dimension_semantics = [#tpu.dimension_semantics<parallel>, #tpu.dimension_semantics<parallel>], iteration_bounds = array<i64: 2, 1>, scalar_prefetch = 0 : i64, scratch_operands = 0 : i64, tpu.core_type = #tpu.core_type<tc>, window_params = [{transform_indices = @transform_0, window_bounds = array<i64: 1, 8, 128>}, {transform_indices = @transform_1, window_bounds = array<i64: 1, 32, 128>}, {transform_indices = @transform_2, window_bounds = array<i64: 1, 8, 128>}, {transform_indices = @transform_3, window_bounds = array<i64: 1, 32, 128>}, {transform_indices = @transform_4, window_bounds = array<i64: 1, 8, 128>}, {pipeline_mode = #tpu.pipeline_mode<synchronous>, transform_indices = @transform_5, window_bounds = array<i64: 128, 128>}, {pipeline_mode = #tpu.pipeline_mode<synchronous>, transform_indices = @transform_6, window_bounds = array<i64: 1, 128>}, {pipeline_mode = #tpu.pipeline_mode<synchronous>, transform_indices = @transform_7, window_bounds = array<i64: 128, 128>}, {pipeline_mode = #tpu.pipeline_mode<synchronous>, transform_indices = @transform_8, window_bounds = array<i64: 1, 128>}, {pipeline_mode = #tpu.pipeline_mode<synchronous>, transform_indices = @transform_9, window_bounds = array<i64: 8, 32>}, {pipeline_mode = #tpu.pipeline_mode<synchronous>, transform_indices = @transform_10, window_bounds = array<i64: 8, 8>}, {transform_indices = @transform_11, window_bounds = array<i64: 1, 8, 128>}]} {
    %c32_i32 = arith.constant 32 : i32
    %0 = arith.muli %arg1, %c32_i32 : i32
    %c0 = arith.constant 0 : index
    %c0_0 = arith.constant 0 : index
    %c0_1 = arith.constant 0 : index
    %1 = vector.load %arg2[%c0, %c0_0, %c0_1] : memref<1x8x128xf32, #tpu.memory_space<vmem>>, vector<1x8x128xf32>
    %2 = vector.shape_cast %1 : vector<1x8x128xf32> to vector<8x128xf32>
    %c0_2 = arith.constant 0 : index
    %c0_3 = arith.constant 0 : index
    %3 = vector.load %arg7[%c0_2, %c0_3] : memref<128x128xf32, #tpu.memory_space<vmem>>, vector<128x128xf32>
    %cst = arith.constant dense<0.000000e+00> : vector<8x128xf32>
    %4 = tpu.matmul %2, %3, %cst {dimension_numbers = #tpu.dot_dimension_numbers<[1], [0], [0], [1], [0, 0, 1, 1], [], []>} : vector<8x128xf32>, vector<128x128xf32>, vector<8x128xf32> -> vector<8x128xf32>
    %c0_4 = arith.constant 0 : index
    %c0_5 = arith.constant 0 : index
    %5 = vector.load %arg8[%c0_4, %c0_5] : memref<1x128xf32, #tpu.memory_space<vmem>>, vector<1x128xf32>
    %6 = vector.broadcast %5 : vector<1x128xf32> to vector<8x128xf32>
    %7 = arith.addf %4, %6 : vector<8x128xf32>
    %c0_6 = arith.constant 0 : index
    %c0_7 = arith.constant 0 : index
    %c0_8 = arith.constant 0 : index
    %8 = vector.load %arg3[%c0_6, %c0_7, %c0_8] : memref<1x32x128xf32, #tpu.memory_space<vmem>>, vector<1x32x128xf32>
    %9 = vector.shape_cast %8 : vector<1x32x128xf32> to vector<32x128xf32>
    %cst_9 = arith.constant dense<0.000000e+00> : vector<8x32xf32>
    %10 = tpu.matmul %7, %9, %cst_9 {dimension_numbers = #tpu.dot_dimension_numbers<[1], [1], [0], [0], [0, 0, 1, 0], [], []>} : vector<8x128xf32>, vector<32x128xf32>, vector<8x32xf32> -> vector<8x32xf32>
    %c0_10 = arith.constant 0 : index
    %c0_11 = arith.constant 0 : index
    %c0_12 = arith.constant 0 : index
    %11 = vector.load %arg4[%c0_10, %c0_11, %c0_12] : memref<1x8x128xf32, #tpu.memory_space<vmem>>, vector<1x8x128xf32>
    %12 = vector.shape_cast %11 : vector<1x8x128xf32> to vector<8x128xf32>
    %cst_13 = arith.constant dense<0.000000e+00> : vector<8x8xf32>
    %13 = tpu.matmul %7, %12, %cst_13 {dimension_numbers = #tpu.dot_dimension_numbers<[1], [1], [0], [0], [0, 0, 1, 0], [], []>} : vector<8x128xf32>, vector<8x128xf32>, vector<8x8xf32> -> vector<8x8xf32>
    %14 = tpu.iota {dimensions = array<i32: 1>} : vector<1x32xi32>
    %15 = vector.broadcast %0 : i32 to vector<1x32xi32>
    %16 = arith.addi %15, %14 : vector<1x32xi32>
    %c32_i32_14 = arith.constant 32 : i32
    %17 = arith.addi %0, %c32_i32_14 : i32
    %18 = tpu.iota {dimensions = array<i32: 1>} : vector<1x8xi32>
    %19 = vector.broadcast %17 : i32 to vector<1x8xi32>
    %20 = arith.addi %19, %18 : vector<1x8xi32>
    %c2_i32 = arith.constant 2 : i32
    %21 = vector.broadcast %c2_i32 : i32 to vector<1x32xi32>
    %22 = arith.cmpi sge, %16, %21 : vector<1x32xi32>
    %c10_i32 = arith.constant 10 : i32
    %23 = vector.broadcast %c10_i32 : i32 to vector<1x32xi32>
    %24 = arith.cmpi slt, %16, %23 : vector<1x32xi32>
    %25 = arith.andi %22, %24 : vector<1x32xi1>
    %26 = arith.extui %25 : vector<1x32xi1> to vector<1x32xi32>
    %27 = arith.sitofp %26 : vector<1x32xi32> to vector<1x32xf32>
    %c2_i32_15 = arith.constant 2 : i32
    %28 = vector.broadcast %c2_i32_15 : i32 to vector<1x8xi32>
    %29 = arith.cmpi sge, %20, %28 : vector<1x8xi32>
    %c10_i32_16 = arith.constant 10 : i32
    %30 = vector.broadcast %c10_i32_16 : i32 to vector<1x8xi32>
    %31 = arith.cmpi slt, %20, %30 : vector<1x8xi32>
    %32 = arith.andi %29, %31 : vector<1x8xi1>
    %33 = arith.extui %32 : vector<1x8xi1> to vector<1x8xi32>
    %34 = arith.sitofp %33 : vector<1x8xi32> to vector<1x8xf32>
    %cst_17 = arith.constant dense<0xFF800000> : vector<8xf32>
    %35 = vector.multi_reduction <maximumf>, %10, %cst_17 [1] : vector<8x32xf32> to vector<8xf32>
    %36 = vector.shape_cast %35 : vector<8xf32> to vector<8x1xf32>
    %cst_18 = arith.constant dense<0xFF800000> : vector<8xf32>
    %37 = vector.multi_reduction <maximumf>, %13, %cst_18 [1] : vector<8x8xf32> to vector<8xf32>
    %38 = vector.shape_cast %37 : vector<8xf32> to vector<8x1xf32>
    %39 = arith.maximumf %36, %38 : vector<8x1xf32>
    %40 = vector.broadcast %39 : vector<8x1xf32> to vector<8x32xf32>
    %41 = arith.subf %10, %40 : vector<8x32xf32>
    %42 = math.exp %41 : vector<8x32xf32>
    %c0_19 = arith.constant 0 : index
    %c0_20 = arith.constant 0 : index
    %43 = vector.load %arg11[%c0_19, %c0_20] : memref<8x32xf32, #tpu.memory_space<vmem>>, vector<8x32xf32>
    %44 = vector.broadcast %27 : vector<1x32xf32> to vector<8x32xf32>
    %45 = arith.mulf %43, %44 : vector<8x32xf32>
    %46 = arith.mulf %42, %45 : vector<8x32xf32>
    %47 = vector.broadcast %39 : vector<8x1xf32> to vector<8x8xf32>
    %48 = arith.subf %13, %47 : vector<8x8xf32>
    %49 = math.exp %48 : vector<8x8xf32>
    %c0_21 = arith.constant 0 : index
    %c0_22 = arith.constant 0 : index
    %50 = vector.load %arg12[%c0_21, %c0_22] : memref<8x8xf32, #tpu.memory_space<vmem>>, vector<8x8xf32>
    %51 = vector.broadcast %34 : vector<1x8xf32> to vector<8x8xf32>
    %52 = arith.mulf %50, %51 : vector<8x8xf32>
    %53 = arith.mulf %49, %52 : vector<8x8xf32>
    %cst_23 = arith.constant dense<0.000000e+00> : vector<8xf32>
    %54 = vector.multi_reduction <add>, %46, %cst_23 [1] : vector<8x32xf32> to vector<8xf32>
    %55 = vector.shape_cast %54 : vector<8xf32> to vector<8x1xf32>
    %cst_24 = arith.constant dense<0.000000e+00> : vector<8xf32>
    %56 = vector.multi_reduction <add>, %53, %cst_24 [1] : vector<8x8xf32> to vector<8xf32>
    %57 = vector.shape_cast %56 : vector<8xf32> to vector<8x1xf32>
    %58 = arith.addf %55, %57 : vector<8x1xf32>
    %cst_25 = arith.constant 1.000000e-30 : f32
    %59 = vector.broadcast %cst_25 : f32 to vector<8x1xf32>
    %60 = arith.maximumf %58, %59 : vector<8x1xf32>
    %61 = tpu.reciprocal %60 : vector<8x1xf32> -> vector<8x1xf32>
    %c0_26 = arith.constant 0 : index
    %c0_27 = arith.constant 0 : index
    %c0_28 = arith.constant 0 : index
    %62 = vector.load %arg5[%c0_26, %c0_27, %c0_28] : memref<1x32x128xf32, #tpu.memory_space<vmem>>, vector<1x32x128xf32>
    %63 = vector.shape_cast %62 : vector<1x32x128xf32> to vector<32x128xf32>
    %cst_29 = arith.constant dense<0.000000e+00> : vector<8x128xf32>
    %64 = tpu.matmul %46, %63, %cst_29 {dimension_numbers = #tpu.dot_dimension_numbers<[1], [0], [0], [1], [0, 0, 1, 1], [], []>} : vector<8x32xf32>, vector<32x128xf32>, vector<8x128xf32> -> vector<8x128xf32>
    %c0_30 = arith.constant 0 : index
    %c0_31 = arith.constant 0 : index
    %c0_32 = arith.constant 0 : index
    %65 = vector.load %arg6[%c0_30, %c0_31, %c0_32] : memref<1x8x128xf32, #tpu.memory_space<vmem>>, vector<1x8x128xf32>
    %66 = vector.shape_cast %65 : vector<1x8x128xf32> to vector<8x128xf32>
    %cst_33 = arith.constant dense<0.000000e+00> : vector<8x128xf32>
    %67 = tpu.matmul %53, %66, %cst_33 {dimension_numbers = #tpu.dot_dimension_numbers<[1], [0], [0], [1], [0, 0, 1, 1], [], []>} : vector<8x8xf32>, vector<8x128xf32>, vector<8x128xf32> -> vector<8x128xf32>
    %68 = arith.addf %64, %67 : vector<8x128xf32>
    %69 = vector.broadcast %61 : vector<8x1xf32> to vector<8x128xf32>
    %70 = arith.mulf %68, %69 : vector<8x128xf32>
    %c0_34 = arith.constant 0 : index
    %c0_35 = arith.constant 0 : index
    %71 = vector.load %arg9[%c0_34, %c0_35] : memref<128x128xf32, #tpu.memory_space<vmem>>, vector<128x128xf32>
    %cst_36 = arith.constant dense<0.000000e+00> : vector<8x128xf32>
    %72 = tpu.matmul %70, %71, %cst_36 {dimension_numbers = #tpu.dot_dimension_numbers<[1], [0], [0], [1], [0, 0, 1, 1], [], []>} : vector<8x128xf32>, vector<128x128xf32>, vector<8x128xf32> -> vector<8x128xf32>
    %c0_37 = arith.constant 0 : index
    %c0_38 = arith.constant 0 : index
    %73 = vector.load %arg10[%c0_37, %c0_38] : memref<1x128xf32, #tpu.memory_space<vmem>>, vector<1x128xf32>
    %74 = vector.broadcast %73 : vector<1x128xf32> to vector<8x128xf32>
    %75 = arith.addf %72, %74 : vector<8x128xf32>
    %c0_39 = arith.constant 0 : index
    %c0_40 = arith.constant 0 : index
    %c0_41 = arith.constant 0 : index
    %76 = vector.load %arg13[%c0_39, %c0_40, %c0_41] : memref<1x8x128xf32, #tpu.memory_space<vmem>>, vector<1x8x128xf32>
    %77 = vector.shape_cast %76 : vector<1x8x128xf32> to vector<8x128xf32>
    %78 = vector.shape_cast %75 : vector<8x128xf32> to vector<1x8x128xf32>
    tpu.vector_store %arg13[%c0_39, %c0_40, %c0_41], %78 {strides = array<i32>} : memref<1x8x128xf32, #tpu.memory_space<vmem>>, vector<1x8x128xf32>,
    return
  }
  func.func @transform_0(%arg0: i32, %arg1: i32) -> (i32, i32, i32) {
    %c0_i32 = arith.constant 0 : i32
    %c0_i32_0 = arith.constant 0 : i32
    return %arg0, %arg1, %c0_i32 : i32, i32, i32
  }
  func.func @transform_1(%arg0: i32, %arg1: i32) -> (i32, i32, i32) {
    %c0_i32 = arith.constant 0 : i32
    %c0_i32_0 = arith.constant 0 : i32
    return %arg0, %arg1, %c0_i32 : i32, i32, i32
  }
  func.func @transform_2(%arg0: i32, %arg1: i32) -> (i32, i32, i32) {
    %c1_i32 = arith.constant 1 : i32
    %0 = arith.addi %arg1, %c1_i32 : i32
    %c4_i32 = arith.constant 4 : i32
    %1 = arith.muli %0, %c4_i32 : i32
    %c0_i32 = arith.constant 0 : i32
    %c0_i32_0 = arith.constant 0 : i32
    return %arg0, %1, %c0_i32 : i32, i32, i32
  }
  func.func @transform_3(%arg0: i32, %arg1: i32) -> (i32, i32, i32) {
    %c0_i32 = arith.constant 0 : i32
    %c0_i32_0 = arith.constant 0 : i32
    return %arg0, %arg1, %c0_i32 : i32, i32, i32
  }
  func.func @transform_4(%arg0: i32, %arg1: i32) -> (i32, i32, i32) {
    %c1_i32 = arith.constant 1 : i32
    %0 = arith.addi %arg1, %c1_i32 : i32
    %c4_i32 = arith.constant 4 : i32
    %1 = arith.muli %0, %c4_i32 : i32
    %c0_i32 = arith.constant 0 : i32
    %c0_i32_0 = arith.constant 0 : i32
    return %arg0, %1, %c0_i32 : i32, i32, i32
  }
  func.func @transform_5(%arg0: i32, %arg1: i32) -> (i32, i32) {
    %c0_i32 = arith.constant 0 : i32
    %c0_i32_0 = arith.constant 0 : i32
    %c0_i32_1 = arith.constant 0 : i32
    return %c0_i32, %c0_i32_0 : i32, i32
  }
  func.func @transform_6(%arg0: i32, %arg1: i32) -> (i32, i32) {
    %c0_i32 = arith.constant 0 : i32
    %c0_i32_0 = arith.constant 0 : i32
    %c0_i32_1 = arith.constant 0 : i32
    return %c0_i32, %c0_i32_0 : i32, i32
  }
  func.func @transform_7(%arg0: i32, %arg1: i32) -> (i32, i32) {
    %c0_i32 = arith.constant 0 : i32
    %c0_i32_0 = arith.constant 0 : i32
    %c0_i32_1 = arith.constant 0 : i32
    return %c0_i32, %c0_i32_0 : i32, i32
  }
  func.func @transform_8(%arg0: i32, %arg1: i32) -> (i32, i32) {
    %c0_i32 = arith.constant 0 : i32
    %c0_i32_0 = arith.constant 0 : i32
    %c0_i32_1 = arith.constant 0 : i32
    return %c0_i32, %c0_i32_0 : i32, i32
  }
  func.func @transform_9(%arg0: i32, %arg1: i32) -> (i32, i32) {
    %c0_i32 = arith.constant 0 : i32
    %c0_i32_0 = arith.constant 0 : i32
    %c0_i32_1 = arith.constant 0 : i32
    return %c0_i32, %c0_i32_0 : i32, i32
  }
  func.func @transform_10(%arg0: i32, %arg1: i32) -> (i32, i32) {
    %c0_i32 = arith.constant 0 : i32
    %c0_i32_0 = arith.constant 0 : i32
    %c0_i32_1 = arith.constant 0 : i32
    return %c0_i32, %c0_i32_0 : i32, i32
  }
  func.func @transform_11(%arg0: i32, %arg1: i32) -> (i32, i32, i32) {
    %c0_i32 = arith.constant 0 : i32
    %c0_i32_0 = arith.constant 0 : i32
    return %arg0, %arg1, %c0_i32 : i32, i32, i32
  }
}

</mosaic_0001>

<bundles_post_ra>
// kernel: fwd.1
= control target key start
LH: loop header
LB: loop body
LE: loop exit
PB: predicated region body
PF: predicated region fallthrough
CT: control target
= control target key end

     0   :  { %s1651_s17 = smov 0   ;;  %s1653_s18 = smov 0   ;;  %s1858_s0 = inlined_call_operand.vmem [shape: f32[2,8,128], index: 0, kind: input, shape index: {}]   ;;  %s1859_s1 = inlined_call_operand.vmem [shape: f32[2,40,128], index: 1, kind: input, shape index: {}, may-alias: {1,2}]   ;;  %s1860_s2 = inlined_call_operand.vmem [shape: f32[2,40,128], index: 2, kind: input, shape index: {}, may-alias: {1,2}]   ;;  %s1861_s3 = inlined_call_operand.vmem [shape: f32[2,40,128], index: 3, kind: input, shape index: {}, may-alias: {3,4}]   ;;  %s1862_s4 = inlined_call_operand.vmem [shape: f32[2,40,128], index: 4, kind: input, shape index: {}, may-alias: {3,4}]   ;;  %s1863_s5 = inlined_call_operand.vmem [shape: f32[128,128], index: 5, kind: input, shape index: {}]   ;;  %s1864_s6 = inlined_call_operand.vmem [shape: f32[1,128], index: 6, kind: input, shape index: {}]   ;;  %s1865_s7 = inlined_call_operand.vmem [shape: f32[128,128], index: 7, kind: input, shape index: {}]   ;;  %s1866_s8 = inlined_call_operand.vmem [shape: f32[1,128], index: 8, kind: input, shape index: {}]   ;;  %s1867_s9 = inlined_call_operand.vmem [shape: f32[8,32], index: 9, kind: input, shape index: {}]   ;;  %s1868_s10 = inlined_call_operand.vmem [shape: f32[8,8], index: 10, kind: input, shape index: {}]   ;;  %s1869_s11 = inlined_call_operand.vmem [shape: f32[2,8,128], index: 11, kind: output, shape index: {}]  }
   0x1   :  { %s1655_s19 = smov 0  }
   0x2 LB: > { %s33_s20 = sadd.s32 1, %s1582_s18  ;;  %p1298_p0 = scmp.ge.s32.totalorder %s1586_s19, 1  ;;  %s1586_s19 = sphi %s1655_s19, %s21_s19   ;;  %s1582_s18 = sphi %s1653_s18, %s1871_s18   ;;  %s1578_s17 = sphi %s1651_s17, %s1870_s17  }
   0x3   : > { %p35_p1 = scmp.ge.s32.totalorder %s33_s20, 2  ;;  %p451_p2 = scmp.lt.s32.totalorder %s1586_s19, 3 }
   0x5   : > { %s1873_s20 = smov (%p35_p1, %s33_s20), 0  ;;  %p452_p3 = pnand %p1298_p0, %p451_p2 }
   0x6   : > { %v617_v0 = vld [vmem:[%s1863_s5] sm:$0xff] (!%p452_p3)  ;;  %v618_v1 = vld [vmem:[%s1863_s5 + $0x8] sm:$0xff] (!%p452_p3)  ;;  %v619_v2 = vld [vmem:[%s1863_s5 + $0x10] sm:$0xff] (!%p452_p3)  ;;  %v1588_v3 = vmov (!%p452_p3), 0.0|0.0   ;;  %vm1589_vm0 = vmmov (!%p452_p3), 0   ;;  %v1590_v6 = vmov (!%p452_p3), 0.0   ;;  %v855_v46 = vlaneseq (!%p452_p3) }
   0x7   : > { %455 = sbr.rel (%p452_p3) target bundleno = 1070 (0x42e), region = 64  ;;  %1466 = vmatprep.subr.bf16.mxu0 (!%p452_p3), %v1588_v3  ;;  %v1467_v4 = vpack.c.bf16 (!%p452_p3), %v618_v1, %v617_v0  ;;  %v620_v5 = vld [vmem:[%s1863_s5 + $0x18] sm:$0xff] (!%p452_p3)  ;;  %1396 = vmatprep.mubr.msk.f32.mxu0 (!%p452_p3), %vm1589_vm0, %v1590_v6  ;;  %p541_p4 = scmp.lt.s32.totalorder (!%p452_p3), %s1578_s17, 1  ;;  %v621_v8 = vld [vmem:[%s1863_s5 + $0x20] sm:$0xff] (!%p452_p3)  ;;  %v622_v9 = vld [vmem:[%s1863_s5 + $0x28] sm:$0xff] (!%p452_p3)  ;;  %vm872_vm1 = vcmask (!%p452_p3), 261120  }
   0x8   : > { %1490 = vmatprep.subr.bf16.mxu1 (!%p452_p3), %v1588_v3  ;;  %1407 = vmatprep.mubr.msk.f32.mxu1 (!%p452_p3), %vm1589_vm0, %v1590_v6  ;;  %v1470_v7 = vpack.c.bf16 (!%p452_p3), %v620_v5, %v619_v2  ;;  %v1473_v10 = vpack.c.bf16 (!%p452_p3), %v622_v9, %v621_v8  ;;  %v623_v11 = vld [vmem:[%s1863_s5 + $0x30] sm:$0xff] (!%p452_p3)  ;;  %v624_v12 = vld [vmem:[%s1863_s5 + $0x38] sm:$0xff] (!%p452_p3)  ;;  %v625_v17 = vld [vmem:[%s1863_s5 + $0x40] sm:$0xff] (!%p452_p3)  ;;  %vm876_vm2 = vcmask (!%p452_p3), 64512   ;;  %v856_v49 = vand.u32 (!%p452_p3), 127, %v855_v46 }
   0x9   : > { %1468 = vmatpush3.bf16.msra.mxu0 (!%p452_p3), %v1467_v4  ;;  %v1476_v16 = vpack.c.bf16 (!%p452_p3), %v624_v12, %v623_v11  ;;  %v626_v18 = vld [vmem:[%s1863_s5 + $0x48] sm:$0xff] (!%p452_p3)  ;;  %v627_v22 = vld [vmem:[%s1863_s5 + $0x50] sm:$0xff] (!%p452_p3)  ;;  %v628_v23 = vld [vmem:[%s1863_s5 + $0x58] sm:$0xff] (!%p452_p3) }
   0xa   : > { %1469 = vmatprep.subr.bf16.mxu0 (!%p452_p3), %v1588_v3  ;;  %v1479_v21 = vpack.c.bf16 (!%p452_p3), %v626_v18, %v625_v17  ;;  %v1482_v25 = vpack.c.bf16 (!%p452_p3), %v628_v23, %v627_v22  ;;  %v629_v26 = vld [vmem:[%s1863_s5 + $0x60] sm:$0xff] (!%p452_p3)  ;;  %v630_v27 = vld [vmem:[%s1863_s5 + $0x68] sm:$0xff] (!%p452_p3)  ;;  %v631_v29 = vld [vmem:[%s1863_s5 + $0x70] sm:$0xff] (!%p452_p3)  ;;  %vm862_vm3 = vcmp.ge.s32.totalorder (!%p452_p3), %v856_v49, 2  ;;  %vm863_vm4 = vcmp.lt.s32.totalorder (!%p452_p3), %v856_v49, 10 }
   0xb   : > { %v1485_v28 = vpack.c.bf16 (!%p452_p3), %v630_v27, %v629_v26  ;;  %v632_v30 = vld [vmem:[%s1863_s5 + $0x78] sm:$0xff] (!%p452_p3)  ;;  %v1305_v33 = vld [vmem:[%s1864_s6] ss:$0 sm:$0xff] (!%p452_p3)  ;;  %vm864_vm5 = vmand (!%p452_p3), %vm862_vm3, %vm863_vm4 }
   0xc   : > { %v1488_v31 = vpack.c.bf16 (!%p452_p3), %v632_v30, %v631_v29  ;;  %v1306_v54 = vsel (!%p452_p3), %vm864_vm5, 1.0, %v1590_v6  ;;  %v884_v55 = vld [vmem:[%s1867_s9] sm:$0xff] (!%p452_p3)  ;;  %v1057_v12 = vld [vmem:[%s1865_s7 + $0x18] sm:$0xff] (!%p452_p3)  ;;  %v1060_v17 = vld [vmem:[%s1865_s7 + $0x30] sm:$0xff] (!%p452_p3) }
   0xd   : > { %1471 = vmatpush3.bf16.msra.mxu0 (!%p452_p3), %v1470_v7  ;;  %v890_v56 = vld [vmem:[%s1868_s10] sm:$0xff] (!%p452_p3)  ;;  %v885_v57 = vmul.f32 (!%p452_p3), %v1306_v54, %v884_v55  ;;  %v1061_v18 = vld [vmem:[%s1865_s7 + $0x38] sm:$0xff] (!%p452_p3)  ;;  %v1064_v23 = vld [vmem:[%s1865_s7 + $0x50] sm:$0xff] (!%p452_p3) }
   0xe   : > { %s1875_s17 = smov (!%p541_p4, %s1578_s17), 1  ;;  %1472 = vmatprep.subr.bf16.mxu0 %v1588_v3  ;;  %v891_v58 = vmul.f32 0.0, %v890_v56  ;;  %v1054_v9 = vld [vmem:[%s1865_s7] sm:$0xff]  ;;  %v1067_v27 = vld [vmem:[%s1865_s7 + $0x68] sm:$0xff]  ;;  %v1068_v29 = vld [vmem:[%s1865_s7 + $0x70] sm:$0xff] }
   0xf   : > { %s1697_s14 = smul.u32 40, %s1875_s17  ;;  %s1299_s28 = sshll.u32 %s1875_s17, 3  ;;  %v1066_v26 = vld [vmem:[%s1865_s7 + $0x60] sm:$0xff]  ;;  %v1069_v30 = vld [vmem:[%s1865_s7 + $0x78] sm:$0xff] }
  0x10   : > { %s547_s12 = scalar_lea.vmem %s1858_s0, %s1299_s28  ;;  %s614_s29 = scalar_lea.vmem %s1869_s11, %s1299_s28 }
  0x11   : > { %s560_s25 = scalar_lea.vmem %s1859_s1, %s1697_s14  ;;  %1474 = vmatpush3.bf16.msra.mxu0 %v1473_v10  ;;  %v616_v32 = vld [vmem:[%s547_s12] sm:$0xff]  ;;  %s1313_s13 = sadd.s32 32, %s1697_s14  ;;  %v1055_v10 = vld [vmem:[%s1865_s7 + $0x8] sm:$0xff] }
  0x12   : > { %v710_v13 = vld [vmem:[%s560_s25] sm:$0xff]  ;;  %v711_v14 = vld [vmem:[%s560_s25 + $0x8] sm:$0xff]  ;;  %1475 = vmatprep.subr.bf16.mxu0 %v1588_v3  ;;  %v712_v19 = vld [vmem:[%s560_s25 + $0x10] sm:$0xff]  ;;  %s575_s23 = scalar_lea.vmem %s1860_s2, %s1313_s13  ;;  %s605_s26 = scalar_lea.vmem %s1862_s4, %s1313_s13  ;;  %v1503_v11 = vpack.c.bf16 %v1055_v10, %v1054_v9 }
  0x13   : > { %v1491_v15 = vpack.c.bf16 %v711_v14, %v710_v13  ;;  %v713_v20 = vld [vmem:[%s560_s25 + $0x18] sm:$0xff]  ;;  %v784_v37 = vld [vmem:[%s575_s23] sm:$0xff]  ;;  %s590_s16 = scalar_lea.vmem %s1861_s3, %s1697_s14 }
  0x14   : > { %v1494_v24 = vpack.c.bf16 %v713_v20, %v712_v19  ;;  %v906_v44 = vld [vmem:[%s605_s26] sm:$0xff]  ;;  %v903_v60 = vld [vmem:[%s590_s16 + $0x8] sm:$0xff]  ;;  %v904_v2 = vld [vmem:[%s590_s16 + $0x10] sm:$0xff]  ;;  %v1512_v19 = vpack.c.bf16 %v1061_v18, %v1060_v17 }
  0x15   : > { %1492 = vmatpush3.bf16.xpose.msra.mxu1 %v1491_v15  ;;  %1477 = vmatpush3.bf16.msra.mxu0 %v1476_v16  ;;  %v902_v59 = vld [vmem:[%s590_s16] sm:$0xff]  ;;  %v905_v4 = vld [vmem:[%s590_s16 + $0x18] sm:$0xff]  ;;  %v1059_v15 = vld [vmem:[%s1865_s7 + $0x28] sm:$0xff] }
  0x16   : > { %1493 = vmatprep.subr.bf16.mxu1 %v1588_v3  ;;  %1478 = vmatprep.subr.bf16.mxu0 %v1588_v3  ;;  %v1497_v63 = vpack.c.bf16 %v903_v60, %v902_v59  ;;  %v1500_v7 = vpack.c.bf16 %v905_v4, %v904_v2  ;;  %v1058_v14 = vld [vmem:[%s1865_s7 + $0x20] sm:$0xff] }
  0x17   : > { %v1509_v16 = vpack.c.bf16 %v1059_v15, %v1058_v14  ;;  %v1062_v20 = vld [vmem:[%s1865_s7 + $0x40] sm:$0xff] }
  0x19   : > { %1480 = vmatpush3.bf16.msra.mxu0 %v1479_v21  ;;  %v1063_v21 = vld [vmem:[%s1865_s7 + $0x48] sm:$0xff] }
  0x1a   : > { %1481 = vmatprep.subr.bf16.mxu0 %v1588_v3  ;;  %v1515_v22 = vpack.c.bf16 %v1063_v21, %v1062_v20 }
  0x1d   : > { %1495 = vmatpush3.bf16.xpose.msra.mxu1 %v1494_v24  ;;  %1483 = vmatpush3.bf16.msra.mxu0 %v1482_v25  ;;  %v1065_v24 = vld [vmem:[%s1865_s7 + $0x58] sm:$0xff] }
  0x1e   : > { %1410 = vmatprep.subr.mxu1 %v1590_v6  ;;  %1484 = vmatprep.subr.bf16.mxu0 %v1588_v3  ;;  %v1518_v25 = vpack.c.bf16 %v1065_v24, %v1064_v23 }
  0x21   : > { %1486 = vmatpush3.bf16.msra.mxu0 %v1485_v28  ;;  %v1521_v28 = vpack.c.bf16 %v1067_v27, %v1066_v26 }
  0x22   : > { %1487 = vmatprep.subr.bf16.mxu0 %v1588_v3 }
  0x25   : > { %1489 = vmatpush3.bf16.msra.mxu0 %v1488_v31  ;;  %v1524_v31 = vpack.c.bf16 %v1069_v30, %v1068_v29 }
  0x26   : > { %1502 = vmatprep.subr.bf16.mxu0 %v1588_v3 }
  0x28   : > { %1397 = vmatmul.mubr.f32.vlgmr.msra.gmra.mrb[0].mxu0 %v616_v32 }
  0x29   : > { %1463 = vmatprep.mubr.msk.f32.mxu0 %vm1589_vm0, %v1590_v6  ;;  %1504 = vmatpush3.bf16.msra.mxu0 %v1503_v11 }
  0x2a   : > { %1505 = vmatprep.subr.bf16.mxu0 %v1588_v3 }
  0xfb   : > { %v706_v34 = vpop.f32.mrb[0].mxu0 }
  0xfc   : > { %v707_v35 = vadd.f32 %v1305_v33, %v706_v34  ;;  %v1398_v36 = vpop.f32.mrb[1].mxu0 }
  0xfe   : > { %1408 = vmatmul.mubr.f32.vlgmr.msra.gmra.mrb[0].mxu1 %v707_v35 }
  0xff   : > { %1411 = vmatpush3.xpose.msra.mxu1 %v784_v37  ;;  %1412 = vmatprep.mubr.msk.f32.mxu1 %vm1589_vm0, %v1590_v6 }
 0x100   : > { %1415 = vmatprep.subr.mxu1 %v1590_v6 }
 0x102   : > { %1413 = vmatmul.mubr.f32.vlgmr.msra.gmra.mrb[2].mxu1 %v707_v35 }
 0x103   : > { %1417 = vmatprep.mubr.msk.f32.mxu1 %vm1589_vm0, %v1590_v6  ;;  %1416 = vmatpush3.msra.mxu1 %v906_v44 }
 0x104   : > { %1496 = vmatprep.subr.bf16.mxu1 %v1588_v3 }
 0x1d1   : > { %v780_v38 = vpop.f32.mrb[0].mxu1 }
 0x1d2   : > { %v1409_v39 = vpop.f32.mrb[1].mxu1  ;;  %v873_v40 = vsel %vm872_vm1, %v780_v38, -inf }
 0x1d3   : > { %874 = vmax.xlane.f32.xlu0 %v873_v40  ;;  %v1309_v39 = vld [vmem:[%s1866_s8] ss:$0 sm:$0xff] }
 0x1d5   : > { %v851_v41 = vpop.f32.mrb[2].mxu1 }
 0x1d6   : > { %v1414_v42 = vpop.f32.mrb[3].mxu1  ;;  %v877_v43 = vsel %vm876_vm2, %v851_v41, -inf }
 0x1d7   : > { %878 = vmax.xlane.f32.xlu0 %v877_v43 }
 0x260   : > { %v875_v45 = vpop.xlane.xlu0 %874 }
 0x264   : > { %v879_v47 = vpop.xlane.xlu0 %878 }
 0x265   : > { %v880_v48 = vmax.f32 %v875_v45, %v879_v47 }
 0x267   : > { %v881_v50 = vsub.f32 %v780_v38, %v880_v48  ;;  %v887_v51 = vsub.f32 %v851_v41, %v880_v48 }
 0x269   : > { %v882_v52 = vmul.f32 1.442695, %v881_v50  ;;  %v888_v53 = vmul.f32 1.442695, %v887_v51 }
 0x26b   : > { %1558 = vpow2.f32 %v882_v52 }
 0x26c   : > { %1560 = vpow2.f32 %v888_v53 }
 0x275   : > { %v1559_v61 = vpop.eup %1558 }
 0x276   : > { %v1561_v62 = vpop.eup %1560  ;;  %v886_v0 = vmul.f32 %v1559_v61, %v885_v57 }
 0x277   : > { %v892_v1 = vmul.f32 %v1561_v62, %v891_v58 }
 0x278   : > { %v893_v5 = vsel %vm872_vm1, %v886_v0, 0.0 }
 0x279   : > { %1418 = vmatmul.mubr.msk.f32.vlgmr.msra.gmra.mrb[4].mxu1 %vm876_vm2, %v892_v1  ;;  %894 = vadd.xlane.f32.xlu1 %v893_v5  ;;  %v896_v8 = vsel %vm876_vm2, %v892_v1, 0.0 }
 0x27a   : > { %1498 = vmatpush3.bf16.msra.mxu1 %v1497_v63  ;;  %1428 = vmatprep.mubr.msk.f32.mxu1 %vm1589_vm0, %v1590_v6  ;;  %v1056_v6 = vld [vmem:[%s1865_s7 + $0x10] sm:$0xff] }
 0x27b   : > { %1499 = vmatprep.subr.bf16.mxu1 %v1588_v3  ;;  %v1506_v13 = vpack.c.bf16 %v1057_v12, %v1056_v6 }
 0x27d   : > { %897 = vadd.xlane.f32.xlu1 %v896_v8  ;;  %1507 = vmatpush3.bf16.msra.mxu0 %v1506_v13 }
 0x27e   : > { %1501 = vmatpush3.bf16.msra.mxu1 %v1500_v7  ;;  %1508 = vmatprep.subr.bf16.mxu0 %v1588_v3 }
 0x281   : > { %1429 = vmatmul.mubr.msk.f32.vlgmr.msra.gmra.mrb[4].mxu1 %vm872_vm1, %v886_v0  ;;  %1510 = vmatpush3.bf16.msra.mxu0 %v1509_v16 }
 0x282   : > { %1511 = vmatprep.subr.bf16.mxu0 %v1588_v3 }
 0x285   : > { %1513 = vmatpush3.bf16.msra.mxu0 %v1512_v19 }
 0x286   : > { %1514 = vmatprep.subr.bf16.mxu0 %v1588_v3 }
 0x289   : > { %1516 = vmatpush3.bf16.msra.mxu0 %v1515_v22 }
 0x28a   : > { %1517 = vmatprep.subr.bf16.mxu0 %v1588_v3 }
 0x28d   : > { %1519 = vmatpush3.bf16.msra.mxu0 %v1518_v25 }
 0x28e   : > { %1520 = vmatprep.subr.bf16.mxu0 %v1588_v3 }
 0x291   : > { %1522 = vmatpush3.bf16.msra.mxu0 %v1521_v28 }
 0x292   : > { %1523 = vmatprep.subr.bf16.mxu0 %v1588_v3 }
 0x295   : > { %1525 = vmatpush3.bf16.msra.mxu0 %v1524_v31 }
 0x306   : > { %v895_v32 = vpop.xlane.xlu1 %894 }
 0x30a   : > { %v898_v33 = vpop.xlane.xlu1 %897 }
 0x30b   : > { %v899_v34 = vadd.f32 %v898_v33, %v895_v32 }
 0x30d   : > { %v900_v35 = vmax.f32 %v899_v34, 1e-30 }
 0x30f   : > { %1562 = vrcp.f32 %v900_v35 }
 0x319   : > { %v1563_v36 = vpop.eup %1562 }
 0x354   : > { %v1049_v37 = vpop.f32.mrb[4].mxu1 }
 0x355   : > { %v1053_v38 = vmul.f32 %v1563_v36, %v1049_v37  ;;  %v1430_v3 = vpop.f32.mrb[5].mxu1 }
 0x357   : > { %1464 = vmatmul.mubr.f32.vlgmr.msra.gmra.mrb[2].mxu0 %v1053_v38 }
 0x42a   : > { %v1143_v40 = vpop.f32.mrb[2].mxu0 }
 0x42b   : > { %v1144_v41 = vadd.f32 %v1309_v39, %v1143_v40  ;;  %v1465_v42 = vpop.f32.mrb[3].mxu0 }
 0x42d   : > { %1147 = vst [vmem:[%s614_s29] sm:$0xff] %v1144_v41 }
 0x42e PF: > { %s21_s19 = sadd.s32 1, %s1586_s19   ;;  %s1870_s17 = smov %s1582_s18 }
 0x42f   : > { %p18_p5 = scmp.ge.s32.totalorder %s21_s19, 4   ;;  %s1871_s18 = smov %s1873_s20 }
 0x431   :  { %20 = sbr.rel (!%p18_p5) target bundleno = 2 (0x2), region = 106 }

</bundles_post_ra>
